<compile_context>
chip_gen: v7x
topology: tpu7x:2x2x1
jax: 0.10.0
libtpu: 0.0.40
codegen_flags: <defaults>
</compile_context>

<pallas_src>
import math

import jax
import jax.numpy as jnp
from jax.experimental import pallas as pl
from jax.experimental.pallas import tpu as pltpu


def _round_up(x, m):
    return (x + m - 1) // m * m


def _batches_per_tile(B, n1_pad, target_rows=512):
    """Largest divisor of B whose tile stays <= target_rows, while keeping at
    least 2 grid steps when possible (so v7x megacore has work to split)."""
    best = 1
    for d in range(1, B + 1):
        if B % d:
            continue
        if d * n1_pad > target_rows:
            break
        if d == 1 or B // d >= 2:
            best = d
    return best


def patch_embed_kernel(p_ref, w_ref, add_ref, o_ref):
    """One M-tile (bpt batch elements x N1_pad rows) per grid step.

    p_ref:   (tile_m, K_pad)  bf16 im2col patch rows; row 0 of every batch
                              block is the all-zero CLS slot, tail rows are pad.
    w_ref:   (K_pad, E_pad)   bf16 conv weight reshaped+transposed (resident).
    add_ref: (tile_m, E_pad)  f32  folded (cls|bias) + pos_embed (resident).
    o_ref:   (tile_m, E_pad)  f32  output tile.
    """
    y = jnp.dot(p_ref[...], w_ref[...], preferred_element_type=jnp.float32)
    o_ref[...] = (y + add_ref[...]).astype(o_ref.dtype)
    # TODO(synk): nn.Dropout(0.1) omitted — identity in eval/inference mode.


def patch_embedding(x, params, *, patch_size):
    """x: (B, C, H, W) float32.  params: {'w','b','cls','pos'} as in the module."""
    B, C, H, W = x.shape
    P = patch_size
    assert H % P == 0 and W % P == 0
    Hp, Wp = H // P, W // P
    N = Hp * Wp
    E = params["w"].shape[0]
    K = C * P * P
    N1 = N + 1

    # MXU / lane-dense padding.
    K_pad = _round_up(K, 128)
    E_pad = _round_up(E, 128)
    N1_pad = _round_up(N1, 16)

    bpt = _batches_per_tile(B, N1_pad)     # batch elements fused per M-tile
    tile_m = bpt * N1_pad
    n_tiles = B // bpt
    M = B * N1_pad

    # ---- im2col + CLS slot + padding + bf16 downcast (one XLA copy fusion) --
    # Patch order = row-major (hp*Wp + wp); per-patch element order (c, pi, pj)
    # matches Conv2d weight flattening (E, C, P, P) -> (E, K).
    patches = x.reshape(B, C, Hp, P, Wp, P).transpose(0, 2, 4, 1, 3, 5)
    patches = patches.reshape(B, N, K)
    patches = jnp.pad(patches, ((0, 0), (1, N1_pad - N1), (0, K_pad - K)))
    patches = patches.reshape(M, K_pad).astype(jnp.bfloat16)
    # TODO(synk): for large images, skip this wrapper im2col and read x directly
    # with a per-patch-row BlockSpec, forming the (Wp, C*P*P) rows in-kernel.

    # Grid-invariant bf16 weight (K_pad, E_pad): y = patches @ W^T.
    w_t = params["w"].reshape(E, K).T
    w_t = jnp.pad(w_t, ((0, K_pad - K), (0, E_pad - E))).astype(jnp.bfloat16)

    # Fold conv bias + cls_token + pos_embed into one f32 additive term,
    # replicated bpt times so it matches every tile exactly (grid-invariant).
    addend = jnp.concatenate(
        [params["cls"][0] + params["pos"][0, :1],        # CLS row
         params["b"][None, :] + params["pos"][0, 1:]],   # patch rows
        axis=0)                                          # (N1, E)
    addend = jnp.pad(addend, ((0, N1_pad - N1), (0, E_pad - E)))
    addend = jnp.tile(addend, (bpt, 1))                  # (tile_m, E_pad)

    cost = pl.CostEstimate(
        flops=2 * M * K_pad * E_pad,
        transcendentals=0,
        bytes_accessed=(2 * M * K_pad + 2 * K_pad * E_pad
                        + 4 * tile_m * E_pad + 4 * M * E_pad),
    )

    out = pl.pallas_call(
        patch_embed_kernel,
        out_shape=jax.ShapeDtypeStruct((M, E_pad), jnp.float32),
        grid_spec=pltpu.PrefetchScalarGridSpec(
            num_scalar_prefetch=0,
            grid=(n_tiles,),
            in_specs=[
                pl.BlockSpec((tile_m, K_pad), lambda i: (i, 0)),   # patches
                pl.BlockSpec((K_pad, E_pad), lambda i: (0, 0)),    # W^T (resident)
                pl.BlockSpec((tile_m, E_pad), lambda i: (0, 0)),   # addend (resident)
            ],
            out_specs=pl.BlockSpec((tile_m, E_pad), lambda i: (i, 0)),
        ),
        compiler_params=pltpu.CompilerParams(
            dimension_semantics=("parallel",)),
        cost_estimate=cost,
    )(patches, w_t, addend)

    # Strip row / lane padding (single post-call slice).
    return out.reshape(B, N1_pad, E_pad)[:, :N1, :E].astype(x.dtype)


def init_params(key, in_channels, patch_size, embed_dim, num_patches):
    """Conv2d default init; cls/pos drawn randomly so the test exercises them
    (the torch module inits them to zeros, which would hide bugs)."""
    E, C, P = embed_dim, in_channels, patch_size
    k1, k2, k3, k4 = jax.random.split(key, 4)
    fan_in = C * P * P
    bound = 1.0 / math.sqrt(fan_in)
    return {
        "w": jax.random.uniform(k1, (E, C, P, P), jnp.float32, -bound, bound),
        "b": jax.random.uniform(k2, (E,), jnp.float32, -bound, bound),
        "cls": 0.02 * jax.random.normal(k3, (1, 1, E), jnp.float32),
        "pos": 0.02 * jax.random.normal(k4, (1, num_patches + 1, E), jnp.float32),
    }


def reference(x, params, *, patch_size):
    """Pure-JAX f32 reference mirroring the PyTorch forward exactly."""
    B = x.shape[0]
    y = jax.lax.conv_general_dilated(
        x, params["w"], window_strides=(patch_size, patch_size),
        padding="VALID", dimension_numbers=("NCHW", "OIHW", "NCHW"))
    y = y + params["b"][None, :, None, None]
    _, E, Hp, Wp = y.shape
    y = y.reshape(B, E, Hp * Wp).transpose(0, 2, 1)                 # (B, N, E)
    cls = jnp.broadcast_to(params["cls"], (B, 1, E))
    y = jnp.concatenate([cls, y], axis=1)                           # (B, N+1, E)
    return y + params["pos"]                                        # dropout = id


if __name__ == "__main__":
    B, C, IMG, P, E = 2, 4, 16, 4, 32
    N = (IMG // P) ** 2

    key = jax.random.PRNGKey(0)
    kx, kp = jax.random.split(key)
    x = jax.random.normal(kx, (B, C, IMG, IMG), jnp.float32)
    params = init_params(kp, C, P, E, N)

    out = jax.block_until_ready(patch_embedding(x, params, patch_size=P))
    ref = reference(x, params, patch_size=P)

    assert out.shape == (B, N + 1, E)
    # bf16 MXU operands with f32 accumulation -> tolerance relaxed vs f32 ref.
    err = float(jnp.max(jnp.abs(out - ref)))
    assert jnp.allclose(out, ref, atol=2e-2, rtol=2e-2), err
    print("KERNEL_OK")
</pallas_src>

<mosaic_0001>
module attributes {stable_mosaic.version = 11 : i64} {
  func.func @patch_embed_kernel(%arg0: i32, %arg1: memref<32x128xbf16, #tpu.memory_space<vmem>>, %arg2: memref<128x128xbf16, #tpu.memory_space<vmem>>, %arg3: memref<32x128xf32, #tpu.memory_space<vmem>>, %arg4: memref<32x128xf32, #tpu.memory_space<vmem>>) attributes {dimension_semantics = [#tpu.dimension_semantics<parallel>], iteration_bounds = array<i64: 2>, scalar_prefetch = 0 : i64, scratch_operands = 0 : i64, tpu.core_type = #tpu.core_type<tc>, window_params = [{transform_indices = @transform_0, window_bounds = array<i64: 32, 128>}, {pipeline_mode = #tpu.pipeline_mode<synchronous>, transform_indices = @transform_1, window_bounds = array<i64: 128, 128>}, {pipeline_mode = #tpu.pipeline_mode<synchronous>, transform_indices = @transform_2, window_bounds = array<i64: 32, 128>}, {transform_indices = @transform_3, window_bounds = array<i64: 32, 128>}]} {
    %c0 = arith.constant 0 : index
    %c0_0 = arith.constant 0 : index
    %0 = vector.load %arg1[%c0, %c0_0] : memref<32x128xbf16, #tpu.memory_space<vmem>>, vector<32x128xbf16>
    %c0_1 = arith.constant 0 : index
    %c0_2 = arith.constant 0 : index
    %1 = vector.load %arg2[%c0_1, %c0_2] : memref<128x128xbf16, #tpu.memory_space<vmem>>, vector<128x128xbf16>
    %cst = arith.constant dense<0.000000e+00> : vector<32x128xf32>
    %2 = tpu.matmul %0, %1, %cst {dimension_numbers = #tpu.dot_dimension_numbers<[1], [0], [0], [1], [0, 0, 1, 1], [], []>} : vector<32x128xbf16>, vector<128x128xbf16>, vector<32x128xf32> -> vector<32x128xf32>
    %c0_3 = arith.constant 0 : index
    %c0_4 = arith.constant 0 : index
    %3 = vector.load %arg3[%c0_3, %c0_4] : memref<32x128xf32, #tpu.memory_space<vmem>>, vector<32x128xf32>
    %4 = arith.addf %2, %3 : vector<32x128xf32>
    %c0_5 = arith.constant 0 : index
    %c0_6 = arith.constant 0 : index
    %5 = vector.load %arg4[%c0_5, %c0_6] : memref<32x128xf32, #tpu.memory_space<vmem>>, vector<32x128xf32>
    tpu.vector_store %arg4[%c0_5, %c0_6], %4 {strides = array<i32>} : memref<32x128xf32, #tpu.memory_space<vmem>>, vector<32x128xf32>,
    return
  }
  func.func @transform_0(%arg0: i32) -> (i32, i32) {
    %c0_i32 = arith.constant 0 : i32
    %c0_i32_0 = arith.constant 0 : i32
    return %arg0, %c0_i32 : i32, i32
  }
  func.func @transform_1(%arg0: i32) -> (i32, i32) {
    %c0_i32 = arith.constant 0 : i32
    %c0_i32_0 = arith.constant 0 : i32
    %c0_i32_1 = arith.constant 0 : i32
    return %c0_i32, %c0_i32_0 : i32, i32
  }
  func.func @transform_2(%arg0: i32) -> (i32, i32) {
    %c0_i32 = arith.constant 0 : i32
    %c0_i32_0 = arith.constant 0 : i32
    %c0_i32_1 = arith.constant 0 : i32
    return %c0_i32, %c0_i32_0 : i32, i32
  }
  func.func @transform_3(%arg0: i32) -> (i32, i32) {
    %c0_i32 = arith.constant 0 : i32
    %c0_i32_0 = arith.constant 0 : i32
    return %arg0, %c0_i32 : i32, i32
  }
}

</mosaic_0001>

<bundles_post_ra>
// kernel: tpu_custom_call.1
= control target key start
LH: loop header
LB: loop body
LE: loop exit
PB: predicated region body
PF: predicated region fallthrough
CT: control target
= control target key end

     0   :  { %8 = vsyncpa [#allocation3], 0  ;;  %s1036_s0 = inlined_call_operand.hbm [shape: bf16[64,128], index: 0, kind: input, shape index: {}]   ;;  %s1037_s1 = inlined_call_operand.hbm [shape: bf16[128,128], index: 1, kind: input, shape index: {}]   ;;  %s1038_s2 = inlined_call_operand.hbm [shape: f32[32,128], index: 2, kind: input, shape index: {}]   ;;  %s1039_s3 = inlined_call_operand.hbm [shape: f32[64,128], index: 3, kind: output, shape index: {}]  }
   0x1   :  { %10 = vsyncpa [#allocation3 + $0x1], 0 }
   0x2   :  { %11 = vsyncpa [#allocation6], 0 }
   0x3   :  { %12 = vsyncpa [#allocation4], 0 }
   0x4   :  { %14 = vsyncpa [#allocation4 + $0x1], 0  ;;  %s795_s12 = smov 0   ;;  %s797_s13 = smov 0  }
   0x5   :  { %s799_s14 = smov 0   ;;  %s801_s15 = smov 0  }
   0x6 LB: > { %s816_s16 = sadd.s32 4294967295, %s763_s15   ;;  %s464_s17 = sadd.s32 4294967294, %s763_s15   ;;  %s763_s15 = sphi %s801_s15, %s1059_s15   ;;  %s759_s14 = sphi %s799_s14, %s1058_s14   ;;  %s755_s13 = sphi %s797_s13, %s1057_s13   ;;  %s751_s12 = sphi %s795_s12, %s1056_s12  }
   0x7   : > { %p40_p0 = scmp.ne.s32.totalorder %s755_s13, %s751_s12  ;;  %p1040_p1 = scmp.eq.s32.totalorder %s816_s16, 0 }
   0x8   : > { %p112_p3 = scmp.eq.s32.totalorder %s464_s17, 1  ;;  %p465_p5 = scmp.ge.s32.totalorder %s763_s15, 1 }
   0x9   : > { %p825_p4 = por %p1040_p1, %p40_p0  ;;  %p119_p7 = scmp.lt.s32.totalorder %s763_s15, 3 }
   0xa   : > { %p830_p6 = por %p112_p3, %p40_p0  ;;  %s765_s21 = smov [#allocation5]  }
   0xb   : > { %s1043_s18 = scalar_select %p825_p4, 1, 0 }
   0xc   : > { %s1044_s19 = scalar_select %p830_p6, 1, 0 }
   0xd   : > { %p835_p8 = pnand %p465_p5, %p119_p7  ;;  %s131_s22 = sshll.u32 %s765_s21, 4  ;;  %s839_s22 = int_to_ptr.vmem [resolvable:$true] %s131_s22 }
   0xe   : > { %s766_s24 = smov [#allocation7]   ;;  %s607_s28 = scalar_lea.hbm %s1037_s1, 1024 }
   0xf   : > { %p536_p9 = pneg %p835_p8  ;;  %s144_s25 = sshll.u32 %s766_s24, 4  ;;  %s850_s25 = int_to_ptr.vmem [resolvable:$true] %s144_s25 }
  0x10   : > { %p608_p12 = scmp.ne.s32.totalorder %s1037_s1, %s607_s28  ;;  %p614_p5 = scmp.lt.u32.totalorder %s607_s28, %s1037_s1 }
  0x11   : > { %p846_p11 = pnand %p536_p9, %p1040_p1 }
  0x13   : > { %p609_p13 = pneg %p846_p11 }
  0x15   : > { %p610_p0 = pnand %p609_p13, %p608_p12 }
  0x17   : > { %p611_p3 = pneg %p610_p0 }
  0x19   : > { %p616_p7 = pnand %p614_p5, %p611_p3 }
  0x1b   : > { %619 = shalt.err (!%p616_p7)
}
  0x1c   : > { %s620_s6 = scalar_lea.vmem %s839_s22, 1024  ;;  %p628_p2 = scmp.lt.s32.totalorder %s839_s22, %s839_s22 }
  0x1d   : > { %p621_p9 = scmp.ne.s32.totalorder %s839_s22, %s620_s6  ;;  %p629_p12 = scmp.lt.s32.totalorder %s620_s6, %s620_s6 }
  0x1f   : > { %p623_p10 = pnand %p621_p9, %p609_p13  ;;  %p630_p0 = por %p629_p12, %p628_p2 }
  0x21   : > { %p624_p1 = pneg %p623_p10 }
  0x23   : > { %p631_p6 = pnand %p630_p0, %p624_p1 }
  0x25   : > { %634 = shalt.err (!%p631_p6)
}
  0x26   : > { %s767_s7 = smov 64   ;;  %s768_s8 = smov 4  }
  0x27   : > { %539 = dma.hbm_to_vmem [thread:$0]  (!%p846_p11), %s1037_s1, 1024, %s839_s22, [#allocation6], %s767_s7, %s767_s7, %s768_s8  }
  0x28   : > { %s635_s21 = scalar_lea.hbm %s1038_s2, 512 }
  0x29   : > { %p636_p1 = scmp.ne.s32.totalorder %s1038_s2, %s635_s21  ;;  %p642_p10 = scmp.lt.u32.totalorder %s635_s21, %s1038_s2 }
  0x2b   : > { %p638_p2 = pnand %p636_p1, %p609_p13 }
  0x2d   : > { %p639_p6 = pneg %p638_p2 }
  0x2f   : > { %p644_p3 = pnand %p642_p10, %p639_p6 }
  0x31   : > { %647 = shalt.err (!%p644_p3)
}
  0x32   : > { %s648_s22 = scalar_lea.vmem %s850_s25, 512  ;;  %p656_p12 = scmp.lt.s32.totalorder %s850_s25, %s850_s25 }
  0x33   : > { %p649_p5 = scmp.ne.s32.totalorder %s850_s25, %s648_s22  ;;  %p657_p0 = scmp.lt.s32.totalorder %s648_s22, %s648_s22 }
  0x35   : > { %p651_p7 = pnand %p649_p5, %p609_p13  ;;  %p658_p1 = por %p657_p0, %p656_p12 }
  0x37   : > { %p652_p9 = pneg %p651_p7 }
  0x39   : > { %p659_p2 = pnand %p658_p1, %p652_p9 }
  0x3b   : > { %662 = shalt.err (!%p659_p2)
}
  0x3c   : > { %s769_s29 = smov 128   ;;  %s770_s30 = smov 8  }
  0x3d   : > { %542 = dma.hbm_to_vmem [thread:$0]  (!%p846_p11), %s1038_s2, 512, %s850_s25, [#allocation6], %s769_s29, %s769_s29, %s770_s30  }
  0x3e   : > { %s908_s6 = sadd.s32 1, %s763_s15   ;;  %s27_s10 = sadd.s32 1, %s759_s14 }
  0x3f   : > { %s24_s9 = ssub.s32 %s763_s15, %s908_s6  ;;  %p34_p6 = scmp.ne.s32.totalorder %s759_s14, %s755_s13 }
  0x40   : > { %p25_p13 = scmp.eq.s32.totalorder %s24_s9, 0  ;;  %p35_p10 = scmp.eq.s32.totalorder %s763_s15, 0 }
  0x41   : > { %p1047_p5 = scmp.eq.s32.totalorder %s816_s16, 1  ;;  %p553_p9 = scmp.lt.s32.totalorder %s763_s15, 2 }
  0x42   : > { %s917_s11 = scalar_select %p25_p13, %s759_s14, %s27_s10  }
  0x43   : > { %p36_p3 = por %p35_p10, %p34_p6  ;;  %p921_p7 = por %p1047_p5, %p34_p6 }
  0x44   : > { %s158_s23 = sand.u32 1, %s759_s14   ;;  %s492_s25 = sshll.u32 %s763_s15, 8 }
  0x45   : > { %s1048_s17 = scalar_select %p921_p7, 1, 0 }
  0x46   : > { %s469_s21 = sshll.u32 %s158_s23, 4  ;;  %s931_s27 = scalar_lea.hbm %s1036_s0, %s492_s25 }
  0x47   : > { %s162_s28 = scalar_lea.vmem [#allocation2], %s469_s21  ;;  %p935_p11 = pnand %p553_p9, %p36_p3 }
  0x48   : > { %s169_s22 = sshll.u32 %s162_s28, 4  ;;  %s939_s30 = scalar_lea.sflag [#allocation3], %s158_s23  ;;  %s933_s22 = int_to_ptr.vmem [resolvable:$true] %s169_s22 }
  0x49   : > { %s663_s4 = scalar_lea.hbm %s931_s27, 256  ;;  %p665_p0 = pneg %p935_p11 }
  0x4a   : > { %p664_p12 = scmp.ne.s32.totalorder %s931_s27, %s663_s4  ;;  %s668_s10 = scalar_lea.hbm %s1036_s0, 512 }
  0x4b   : > { %p669_p13 = scmp.lt.u32.totalorder %s931_s27, %s1036_s0  ;;  %p670_p6 = scmp.lt.u32.totalorder %s668_s10, %s663_s4 }
  0x4c   : > { %p666_p1 = pnand %p665_p0, %p664_p12  ;;  %p672_p3 = scmp.lt.u32.totalorder %s663_s4, %s931_s27 }
  0x4d   : > { %p671_p10 = por %p670_p6, %p669_p13 }
  0x4e   : > { %p667_p2 = pneg %p666_p1 }
  0x4f   : > { %p673_p5 = por %p672_p3, %p671_p10 }
  0x51   : > { %p674_p9 = pnand %p673_p5, %p667_p2 }
  0x53   : > { %677 = shalt.err (!%p674_p9)
}
  0x54   : > { %s678_s23 = scalar_lea.vmem %s933_s22, 256  ;;  %s771_s24 = smov [#allocation2]  }
  0x55   : > { %p679_p12 = scmp.ne.s32.totalorder %s933_s22, %s678_s23  ;;  %s683_s26 = sshll.u32 %s771_s24, 4  ;;  %s684_s26 = int_to_ptr.vmem [resolvable:$false] %s683_s26 }
  0x56   : > { %s685_s28 = scalar_lea.vmem %s684_s26, 512  ;;  %p686_p4 = scmp.lt.s32.totalorder %s933_s22, %s684_s26 }
  0x57   : > { %p681_p1 = pnand %p679_p12, %p665_p0  ;;  %p687_p13 = scmp.lt.s32.totalorder %s685_s28, %s678_s23 }
  0x59   : > { %p682_p7 = pneg %p681_p1  ;;  %p688_p6 = por %p687_p13, %p686_p4 }
  0x5b   : > { %p689_p10 = pnand %p688_p6, %p682_p7 }
  0x5d   : > { %692 = shalt.err (!%p689_p10)
}
  0x5e   : > { %546 = dma.hbm_to_vmem [thread:$0]  (!%p935_p11), %s931_s27, 256, %s933_s22, %s939_s30, %s767_s7, %s767_s7, %s768_s8  }
  0x5f   : > { %181 = sbr.rel (%p835_p8) target bundleno = 371 (0x173), region = 32  ;;  %s973_s4 = sand.u32 (!%p835_p8), 1, %s755_s13  }
  0x60   : > { %s473_s5 = sshll.u32 (!%p835_p8), %s973_s4, 4  ;;  %s184_s9 = scalar_lea.sflag (!%p835_p8), [#allocation3], %s973_s4 }
  0x61   : > { %s187_s10 = scalar_lea.vmem (!%p835_p8), [#allocation2], %s473_s5  ;;  %p1050_p4 = scmp.ne.s32.totalorder (!%p835_p8), %s1043_s18, 0 }
  0x66   : > { %738 = dma.done.wait (%p1050_p4), %s184_s9, 256  }
  0x67   : > { %740 = vsyncadd (%p1050_p4), %s184_s9, 4294967040  ;;  %p1051_p7 = scmp.eq.s32.totalorder %s816_s16, 0 }
  0x69   : > { %742 = dma.done.wait (%p1051_p7), [#allocation6], 1536   ;;  %p1052_p11 = pmov %p1051_p7 }
  0x6a   : > { %v597_v0 = vld [vmem:[#allocation5] sm:$0xff]   ;;  %v598_v1 = vld [vmem:[#allocation5 + $0x8] sm:$0xff]   ;;  %v599_v2 = vld [vmem:[#allocation5 + $0x10] sm:$0xff]   ;;  %s476_s18 = sshll.u32 %s973_s4, 5  ;;  %s493_s8 = sshll.u32 %s816_s16, 9 }
  0x6b   : > { %744 = vsyncadd (%p1052_p11), [#allocation6], 4294965760  ;;  %504 = vmatprep.subr.bf16.mxu0 %v597_v0  ;;  %v600_v3 = vld [vmem:[#allocation5 + $0x18] sm:$0xff]   ;;  %v605_v4 = vld [vmem:[%s187_s10] sm:$0xff]   ;;  %s217_s20 = scalar_lea.vmem [#allocation8], %s476_s18  ;;  %s992_s29 = scalar_lea.hbm %s1039_s3, %s493_s8 }
  0x6c   : > { %505 = vmatpush3.bf16.msra.mxu0 %v597_v0  ;;  %520 = vmatprep.mubr.bf16.mxu0 %v605_v4  ;;  %v601_v5 = vld [vmem:[#allocation5 + $0x20] sm:$0xff]   ;;  %v602_v6 = vld [vmem:[#allocation5 + $0x28] sm:$0xff]   ;;  %v603_v7 = vld [vmem:[#allocation5 + $0x30] sm:$0xff]   ;;  %s372_s7 = sshll.u32 %s217_s20, 4  ;;  %s359_s16 = scalar_lea.sflag [#allocation4], %s973_s4  ;;  %s987_s7 = int_to_ptr.vmem [resolvable:$true] %s372_s7 }
  0x6d   : > { %506 = vmatprep.subr.bf16.mxu0 %v598_v1  ;;  %v604_v8 = vld [vmem:[#allocation5 + $0x38] sm:$0xff]   ;;  %v243_v10 = vld [vmem:[#allocation7 + $0x10] sm:$0xff]  ;;  %v241_v11 = vld [vmem:[#allocation7] sm:$0xff]  ;;  %s693_s30 = scalar_lea.vmem %s987_s7, 512  ;;  %p1053_p0 = scmp.ne.s32.totalorder %s1048_s17, 0 }
  0x6e   : > { %v606_v9 = vld [vmem:[%s187_s10 + $0x8] sm:$0xff]   ;;  %p694_p8 = scmp.ne.s32.totalorder %s987_s7, %s693_s30  ;;  %s772_s21 = smov [#allocation8]  }
  0x6f   : > { %v244_v13 = vld [vmem:[#allocation7 + $0x18] sm:$0xff]  ;;  %v242_v16 = vld [vmem:[#allocation7 + $0x8] sm:$0xff]  ;;  %s697_s25 = sshll.u32 %s772_s21, 4  ;;  %s698_s25 = int_to_ptr.vmem [resolvable:$false] %s697_s25 }
  0x70   : > { %507 = vmatpush3.bf16.msra.mxu0 %v598_v1  ;;  %p695_p2 = pnand %p694_p8, %p1053_p0  ;;  %s699_s23 = scalar_lea.vmem %s698_s25, 1024 }
  0x71   : > { %508 = vmatprep.subr.bf16.mxu0 %v599_v2  ;;  %p700_p5 = scmp.lt.s32.totalorder %s987_s7, %s698_s25  ;;  %p701_p9 = scmp.lt.s32.totalorder %s699_s23, %s693_s30 }
  0x72   : > { %p696_p3 = pneg %p695_p2 }
  0x73   : > { %p702_p12 = por %p701_p9, %p700_p5 }
  0x74   : > { %509 = vmatpush3.bf16.msra.mxu0 %v599_v2 }
  0x75   : > { %510 = vmatprep.subr.bf16.mxu0 %v600_v3  ;;  %p703_p1 = pnand %p702_p12, %p696_p3 }
  0x78   : > { %511 = vmatpush3.bf16.msra.mxu0 %v600_v3 }
  0x79   : > { %512 = vmatprep.subr.bf16.mxu0 %v601_v5 }
  0x7c   : > { %513 = vmatpush3.bf16.msra.mxu0 %v601_v5 }
  0x7d   : > { %514 = vmatprep.subr.bf16.mxu0 %v602_v6 }
  0x80   : > { %515 = vmatpush3.bf16.msra.mxu0 %v602_v6 }
  0x81   : > { %516 = vmatprep.subr.bf16.mxu0 %v603_v7 }
  0x84   : > { %517 = vmatpush3.bf16.msra.mxu0 %v603_v7 }
  0x85   : > { %518 = vmatprep.subr.bf16.mxu0 %v604_v8 }
  0x88   : > { %519 = vmatpush3.bf16.msra.mxu0 %v604_v8 }
  0x8b   : > { %521 = vmatmul.mubr.bf16.vlgmr.msra.gmra.mrb[0].mxu0 %v606_v9 }
 0x15e   : > { %v522_v12 = vpop.f32.mrb[0].mxu0 }
 0x15f   : > { %v348_v14 = vadd.f32 %v522_v12, %v243_v10  ;;  %v339_v15 = vpop.f32.mrb[1].mxu0 }
 0x160   : > { %v340_v17 = vadd.f32 %v339_v15, %v241_v11  ;;  %v523_v18 = vpop.f32.mrb[2].mxu0 }
 0x161   : > { %356 = vst [vmem:[%s217_s20 + $0x10] sm:$0xff] %v348_v14  ;;  %v351_v19 = vadd.f32 %v523_v18, %v244_v13  ;;  %v342_v20 = vpop.f32.mrb[3].mxu0 }
 0x162   : > { %354 = vst [vmem:[%s217_s20] sm:$0xff] %v340_v17  ;;  %v343_v21 = vadd.f32 %v342_v20, %v242_v16 }
 0x163   : > { %357 = vst [vmem:[%s217_s20 + $0x18] sm:$0xff] %v351_v19 }
 0x164   : > { %355 = vst [vmem:[%s217_s20 + $0x8] sm:$0xff] %v343_v21 }
 0x165   : > { %706 = shalt.err (!%p703_p1)
}
 0x166   : > { %s707_s24 = scalar_lea.hbm %s992_s29, 512  ;;  %s711_s5 = scalar_lea.hbm %s1039_s3, 1024 }
 0x167   : > { %p708_p13 = scmp.ne.s32.totalorder %s992_s29, %s707_s24  ;;  %p712_p4 = scmp.lt.u32.totalorder %s992_s29, %s1039_s3 }
 0x168   : > { %p713_p7 = scmp.lt.u32.totalorder %s711_s5, %s707_s24  ;;  %p715_p8 = scmp.lt.u32.totalorder %s707_s24, %s992_s29 }
 0x169   : > { %p709_p6 = pnand %p708_p13, %p1053_p0 }
 0x16a   : > { %p714_p11 = por %p713_p7, %p712_p4 }
 0x16b   : > { %p710_p10 = pneg %p709_p6 }
 0x16c   : > { %p716_p2 = por %p715_p8, %p714_p11 }
 0x16e   : > { %p717_p3 = pnand %p716_p2, %p710_p10 }
 0x170   : > { %720 = shalt.err (!%p717_p3)
}
 0x171   : > { %s773_s18 = smov 128   ;;  %s774_s20 = smov 8  }
 0x172   : > { %534 = dma.vmem_to_hbm [thread:$0]  (%p1053_p0), %s987_s7, 512, %s992_s29, %s359_s16, %s773_s18, %s773_s18, %s774_s20  }
 0x173 PF: > { %s387_s8 = sand.u32 1, %s751_s12   ;;  %p1054_p5 = scmp.ne.s32.totalorder %s1044_s19, 0 }
 0x174   : > { %p1055_p9 = scmp.ge.s32.totalorder %s763_s15, 2  ;;  %s388_s27 = scalar_lea.sflag [#allocation4], %s387_s8 }
 0x176   : > { %p548_p12 = pnand %p1055_p9, %p1054_p5 }
 0x178   : > { %746 = dma.done.wait (!%p548_p12), %s388_s27, 512  }
 0x179   : > { %748 = vsyncadd (!%p548_p12), %s388_s27, 4294966784  ;;  %p17_p1 = scmp.ge.s32.totalorder %s908_s6, 4   ;;  %s1056_s12 = smov %s755_s13 }
 0x17a   : > { %s1057_s13 = smov %s759_s14  ;;  %s1058_s14 = smov %s917_s11 }
 0x17b   : > { %s1059_s15 = smov %s908_s6  ;;  %19 = sbr.rel (!%p17_p1) target bundleno = 6 (0x6), region = 85 }
 0x182   :  { %393 = vsyncpa [#allocation3], 1 }
 0x183   :  { %395 = vsyncpa [#allocation3 + $0x1], 1 }
 0x184   :  { %396 = vsyncpa [#allocation6], 1 }
 0x185   :  { %397 = vsyncpa [#allocation4], 1 }
 0x186   :  { %399 = vsyncpa [#allocation4 + $0x1], 1 }

</bundles_post_ra>
